<compile_context>
chip_gen: v5e
topology: v5e:2x2
jax: 0.10.0
libtpu: 0.0.40
codegen_flags: <defaults>
</compile_context>

<pallas_src>
import functools

import jax
import jax.numpy as jnp
from jax.experimental import pallas as pl
from jax.experimental.pallas import tpu as pltpu

_BN_EPS = 1e-5
_RRELU_SLOPE = (1.0 / 8.0 + 1.0 / 3.0) / 2.0  # eval-mode RReLU negative slope
_LANE = 128
_SMALL_N_BMM = 32  # at/below this contraction size, do the bmm on the VPU


# ----------------------------------------------------------------------------- helpers
def _round_up(x, m):
    return ((x + m - 1) // m) * m


def _pad_to(x, shape):
    pads = [(0, t - s) for s, t in zip(x.shape, shape)]
    if all(p == (0, 0) for p in pads):
        return x
    return jnp.pad(x, pads)


def _vmem_capacity_bytes():
    """Physical VMEM per core; generation-aware with a conservative (v7x) fallback."""
    try:
        info = pltpu.get_tpu_info()
        cap = getattr(info, "vmem_capacity_bytes", None)
        if cap:
            return int(cap)
    except Exception:
        pass
    return 64 * 1024 * 1024


def _pick_tile_n(b, n, hp, op, budget):
    """Node-row tile for the 3-phase fallback: largest multiple of 8 whose Phase-B
    working set (adj tile x2 buffers, resident bf16 h x2, bf16 w1 x2, bf16 s1 tile x2,
    f32 temporaries) fits the VMEM budget.  N is padded up to a multiple of the tile
    in the wrapper, so any tile value is legal."""
    cap = 512 if budget >= 80 * 1024 * 1024 else 128  # 128 MiB parts vs v7x 64 MiB
    tn = min(cap, _round_up(n, 8))
    while tn > 8:
        npad = _round_up(n, tn)
        need = (2 * b * tn * npad * 2      # adj tile (bf16, double-buffered)
                + 2 * b * npad * hp * 2    # resident h (bf16)
                + 2 * hp * op * 2          # fc1 weight (bf16)
                + 2 * b * tn * op * 2      # s1 output tile (bf16)
                + 2 * b * tn * hp * 4      # f32 out1 temporaries
                + b * tn * op * 4)         # f32 s1 temporary
        if need <= budget:
            return tn
        tn = max(8, (tn // 2) // 8 * 8)
    # TODO(synk): if even an 8-row tile overflows (resident h/s1 too large), the
    # contraction axis would additionally need tiling with an f32 VMEM accumulator.
    return 8


# ----------------------------------------------------------------------------- in-kernel math
def _dense(x3, w, bias=None):
    """(B, T, F) @ (F, H): bf16 MXU operands, f32 accumulation.  The leading-dim
    merge reshape is layout-free for multiple-of-8 T (all call sites)."""
    b, t, f = x3.shape
    hdim = w.shape[1]
    y = jnp.dot(x3.reshape(b * t, f).astype(jnp.bfloat16),
                w.astype(jnp.bfloat16),        # no-op: weights pre-cast in wrapper
                preferred_element_type=jnp.float32)
    if bias is not None:
        y = y + bias                           # (1, H) f32 bias add (VPU)
    return y.reshape(b, t, hdim)


def _bmm(adj, x):
    """adj: (B, T, M), x: (B, M, F) -> (B, T, F) f32."""
    m = adj.shape[2]
    if m <= _SMALL_N_BMM:
        # Tiny contraction: unrolled VPU broadcast-FMA in f32 (an 8-wide contraction
        # on a 128/256-wide systolic array is pure push/pop drain latency).
        adj_f = adj.astype(jnp.float32)
        x_f = x.astype(jnp.float32)
        acc = adj_f[:, :, 0:1] * x_f[:, 0:1, :]
        for k in range(1, m):
            acc = acc + adj_f[:, :, k:k + 1] * x_f[:, k:k + 1, :]
        return acc
    # MXU path: operands are already bf16 (pre-cast in wrapper / bf16 residents),
    # so the astype below is a no-op at trace time; accumulate in f32.
    return jnp.einsum('btm,bmf->btf',
                      adj.astype(jnp.bfloat16), x.astype(jnp.bfloat16),
                      preferred_element_type=jnp.float32)


def _bn(x, gamma, beta, n_valid):
    """BatchNorm1d(num_features=nb_nodes) on a (B, T, Fp) node-tile.

    Per node channel (sublane axis), biased batch statistics over (batch, feature).
    Padded feature columns are exact zeros, so sums are unaffected and the divisor is
    the valid feature count.  Single pass (sum + sum-of-squares); variance clamped to
    >= 0 to guard f32 cancellation.  gamma/beta: (T, 1) -- matches the (1, T, 1)
    batch-stat layout, no lane<->sublane relayout.
    """
    b = x.shape[0]
    inv_count = 1.0 / (b * n_valid)
    s = jnp.sum(x, axis=(0, 2), keepdims=True)         # (1, T, 1)
    sq = jnp.sum(x * x, axis=(0, 2), keepdims=True)    # (1, T, 1)
    mean = s * inv_count
    var = jnp.maximum(sq * inv_count - mean * mean, 0.0)
    scale = jax.lax.rsqrt(var + _BN_EPS) * gamma[None, :, :]
    return (x - mean) * scale + beta[None, :, :]


# ----------------------------------------------------------------------------- kernels
def _fused_kernel(seq_ref, adj_ref, wfc_ref, bfc_ref, wfc1_ref,
                  gamma_ref, beta_ref, o_ref, *, hid_valid, out_valid):
    """Whole forward in one call: everything stays resident in VMEM."""
    adj = adj_ref[...]
    gamma = gamma_ref[...]
    beta = beta_ref[...]
    h = _dense(seq_ref[...], wfc_ref[...], bfc_ref[...])      # fc(seq)      (B,N,Hp) f32
    o1 = _bmm(adj, h)                                          # adj @ h
    o1 = o1 * jax.nn.sigmoid(o1)                               # SiLU (f32)
    o1 = _bn(o1, gamma, beta, hid_valid)                       # BatchNorm1d
    s1 = _dense(o1, wfc1_ref[...])                             # fc1(o1)      (B,N,Op) f32
    s2 = _bmm(adj, s1)                                         # adj @ s1
    s2 = _bn(s2, gamma, beta, out_valid)                       # BatchNorm1d
    o_ref[...] = jnp.where(s2 >= 0, s2, _RRELU_SLOPE * s2)     # RReLU (eval slope)


def _fc_kernel(seq_ref, w_ref, b_ref, h_ref):
    """Tiled Phase A: h = fc(seq), stored bf16 (halves HBM round trip / residency)."""
    h_ref[...] = _dense(seq_ref[...], w_ref[...], b_ref[...]).astype(h_ref.dtype)


def _mid_kernel(adj_ref, h_ref, w1_ref, gamma_ref, beta_ref, s1_ref, *, n_valid):
    """Tiled Phase B: s1 = fc1(BN(SiLU(adj_tile @ h))), stored bf16."""
    out1 = _bmm(adj_ref[...], h_ref[...])                      # bf16 MXU, f32 acc
    out1 = out1 * jax.nn.sigmoid(out1)
    out1 = _bn(out1, gamma_ref[...], beta_ref[...], n_valid)
    s1_ref[...] = _dense(out1, w1_ref[...]).astype(s1_ref.dtype)


def _out_kernel(adj_ref, s1_ref, gamma_ref, beta_ref, o_ref, *, n_valid):
    """Tiled Phase C: out = RReLU(BN(adj_tile @ s1))."""
    s2 = _bmm(adj_ref[...], s1_ref[...])
    s2 = _bn(s2, gamma_ref[...], beta_ref[...], n_valid)
    o_ref[...] = jnp.where(s2 >= 0, s2, _RRELU_SLOPE * s2)


# ----------------------------------------------------------------------------- params
def init_gcn_params(key, in_ft, out_ft, nb_nodes, hid_units):
    """Deterministic parameter init mirroring the PyTorch __init__."""
    k1, k2 = jax.random.split(key)

    def xavier_uniform(k, shape, gain):
        fan_out, fan_in = shape  # torch Linear weight is (out_features, in_features)
        bound = gain * (6.0 / (fan_in + fan_out)) ** 0.5
        return jax.random.uniform(k, shape, jnp.float32, -bound, bound)

    wfc = xavier_uniform(k1, (hid_units, in_ft), gain=2.0)     # fc.weight
    bfc = jnp.zeros((hid_units,), jnp.float32)                 # fc.bias (filled 0)
    wfc1 = xavier_uniform(k2, (out_ft, hid_units), gain=2.0)   # fc1.weight (no bias)
    gamma = jnp.ones((nb_nodes,), jnp.float32)                 # BatchNorm weight
    beta = jnp.zeros((nb_nodes,), jnp.float32)                 # BatchNorm bias
    # self.bias (out_ft,) exists in the torch module but is unused in forward().
    return {
        "wfc_t": wfc.T,        # (in_ft, H)
        "bfc": bfc,            # (H,)
        "wfc1_t": wfc1.T,      # (H, out_ft)
        "gamma": gamma,        # (N,)
        "beta": beta,          # (N,)
    }


# ----------------------------------------------------------------------------- forward
@jax.jit
def gcn_forward(seq, adj, params):
    B, N, in_ft = seq.shape
    hid = params["wfc_t"].shape[1]
    out_ft = params["wfc1_t"].shape[1]

    # Feature dims padded to 128-lane multiples (zero padding is exact: padded weight
    # rows/cols and bias entries are zero; BN divides by the valid feature count).
    fp = _round_up(in_ft, _LANE)
    hp = _round_up(hid, _LANE)
    op = _round_up(out_ft, _LANE)

    budget = int(0.70 * _vmem_capacity_bytes())   # generation-aware VMEM budget

    # bf16 MXU operands cast ONCE here, never per grid step inside a kernel.
    wfc_bf = _pad_to(params["wfc_t"], (fp, hp)).astype(jnp.bfloat16)
    wfc1_bf = _pad_to(params["wfc1_t"], (hp, op)).astype(jnp.bfloat16)
    bfc_p = _pad_to(params["bfc"].reshape(1, hid), (1, hp))          # f32 bias, lane-major
    adj_mx = adj.astype(jnp.bfloat16) if N > _SMALL_N_BMM else adj   # keep f32 for VPU path

    # ---------------- fused single-call path (working set resident in VMEM) --------
    fused_need = 2 * (B * N * fp * 4 + B * N * N * 4 + fp * hp * 2 + hp * op * 2
                      + hp * 4 + 2 * N * 4 + B * N * op * 4) \
                 + B * N * (2 * hp + 2 * op) * 4                     # f32 temporaries
    if fused_need <= budget:
        seq_p = _pad_to(seq, (B, N, fp))
        gamma = params["gamma"].reshape(N, 1)
        beta = params["beta"].reshape(N, 1)
        out_p = pl.pallas_call(
            functools.partial(_fused_kernel, hid_valid=hid, out_valid=out_ft),
            out_shape=jax.ShapeDtypeStruct((B, N, op), jnp.float32),
            compiler_params=pltpu.CompilerParams(vmem_limit_bytes=budget),
        )(seq_p, adj_mx, wfc_bf, bfc_p, wfc1_bf, gamma, beta)
        return out_p[..., :out_ft]

    # ---------------- tiled three-phase fallback (large graphs) --------------------
    tile_n = _pick_tile_n(B, N, hp, op, budget)
    np_ = _round_up(N, tile_n)        # pad node rows so any tile choice divides N
    grid = (np_ // tile_n,)

    seq_p = _pad_to(seq, (B, np_, fp))
    adj_p = _pad_to(adj_mx, (B, np_, np_))              # zero rows/cols: exact
    gamma = _pad_to(params["gamma"].reshape(N, 1), (np_, 1))
    beta = _pad_to(params["beta"].reshape(N, 1), (np_, 1))

    cparams = pltpu.CompilerParams(
        dimension_semantics=("parallel",),              # node tiles independent (BN per node)
        vmem_limit_bytes=budget,
    )

    # Phase A: h = fc(seq), per-node independent -> node-row tiled, stored bf16.
    h = pl.pallas_call(
        _fc_kernel,
        out_shape=jax.ShapeDtypeStruct((B, np_, hp), jnp.bfloat16),
        grid=grid,
        in_specs=[
            pl.BlockSpec((B, tile_n, fp), lambda i: (0, i, 0)),
            pl.BlockSpec((fp, hp), lambda i: (0, 0)),
            pl.BlockSpec((1, hp), lambda i: (0, 0)),
        ],
        out_specs=pl.BlockSpec((B, tile_n, hp), lambda i: (0, i, 0)),
        compiler_params=cparams,
    )(seq_p, wfc_bf, bfc_p)

    # Phase B: s1 = fc1(BN(SiLU(adj @ h))).  adj node-row tiled; bf16 h fully resident
    # (constant block index -> DMA'd once); s1 stored bf16.
    s1 = pl.pallas_call(
        functools.partial(_mid_kernel, n_valid=hid),
        out_shape=jax.ShapeDtypeStruct((B, np_, op), jnp.bfloat16),
        grid=grid,
        in_specs=[
            pl.BlockSpec((B, tile_n, np_), lambda i: (0, i, 0)),
            pl.BlockSpec((B, np_, hp), lambda i: (0, 0, 0)),
            pl.BlockSpec((hp, op), lambda i: (0, 0)),
            pl.BlockSpec((tile_n, 1), lambda i: (i, 0)),
            pl.BlockSpec((tile_n, 1), lambda i: (i, 0)),
        ],
        out_specs=pl.BlockSpec((B, tile_n, op), lambda i: (0, i, 0)),
        compiler_params=cparams,
    )(adj_p, h, wfc1_bf, gamma, beta)

    # Phase C: out = RReLU(BN(adj @ s1)).  bf16 s1 resident, adj node-row tiled.
    out_p = pl.pallas_call(
        functools.partial(_out_kernel, n_valid=out_ft),
        out_shape=jax.ShapeDtypeStruct((B, np_, op), jnp.float32),
        grid=grid,
        in_specs=[
            pl.BlockSpec((B, tile_n, np_), lambda i: (0, i, 0)),
            pl.BlockSpec((B, np_, op), lambda i: (0, 0, 0)),
            pl.BlockSpec((tile_n, 1), lambda i: (i, 0)),
            pl.BlockSpec((tile_n, 1), lambda i: (i, 0)),
        ],
        out_specs=pl.BlockSpec((B, tile_n, op), lambda i: (0, i, 0)),
        compiler_params=cparams,
    )(adj_p, s1, gamma, beta)

    # Slice node-row and feature padding off outside the kernels.
    return out_p[:, :N, :out_ft]


if __name__ == "__main__":
    # Small shapes consistent with the module: batch=2, nb_nodes=8,
    # in_ft=16, hid_units=32, out_ft=16.
    B, N, IN_FT, HID, OUT_FT = 2, 8, 16, 32, 16

    key = jax.random.PRNGKey(0)
    k_seq, k_adj, k_par = jax.random.split(key, 3)

    seq = jax.random.normal(k_seq, (B, N, IN_FT), jnp.float32)
    adj_raw = jax.random.uniform(k_adj, (B, N, N), jnp.float32)
    adj = adj_raw / jnp.sum(adj_raw, axis=-1, keepdims=True)  # row-normalized adjacency

    params = init_gcn_params(k_par, IN_FT, OUT_FT, N, HID)

    out = gcn_forward(seq, adj, params)
    jax.block_until_ready(out)
    assert out.shape == (B, N, OUT_FT) and out.dtype == jnp.float32
    assert bool(jnp.all(jnp.isfinite(out)))
    print("KERNEL_OK")
</pallas_src>

<mosaic_0001>
module attributes {stable_mosaic.version = 11 : i64} {
  func.func @_fused_kernel(%arg0: memref<2x8x128xf32, #tpu.memory_space<vmem>>, %arg1: memref<2x8x8xf32, #tpu.memory_space<vmem>>, %arg2: memref<128x128xbf16, #tpu.memory_space<vmem>>, %arg3: memref<1x128xf32, #tpu.memory_space<vmem>>, %arg4: memref<128x128xbf16, #tpu.memory_space<vmem>>, %arg5: memref<8x1xf32, #tpu.memory_space<vmem>>, %arg6: memref<8x1xf32, #tpu.memory_space<vmem>>, %arg7: memref<2x8x128xf32, #tpu.memory_space<vmem>>) attributes {dimension_semantics = [], scalar_prefetch = 0 : i64, scratch_operands = 0 : i64, tpu.core_type = #tpu.core_type<tc>} {
    %c0 = arith.constant 0 : index
    %c0_0 = arith.constant 0 : index
    %c0_1 = arith.constant 0 : index
    %0 = vector.load %arg1[%c0, %c0_0, %c0_1] : memref<2x8x8xf32, #tpu.memory_space<vmem>>, vector<2x8x8xf32>
    %c0_2 = arith.constant 0 : index
    %c0_3 = arith.constant 0 : index
    %1 = vector.load %arg5[%c0_2, %c0_3] : memref<8x1xf32, #tpu.memory_space<vmem>>, vector<8x1xf32>
    %c0_4 = arith.constant 0 : index
    %c0_5 = arith.constant 0 : index
    %2 = vector.load %arg6[%c0_4, %c0_5] : memref<8x1xf32, #tpu.memory_space<vmem>>, vector<8x1xf32>
    %c0_6 = arith.constant 0 : index
    %c0_7 = arith.constant 0 : index
    %c0_8 = arith.constant 0 : index
    %3 = vector.load %arg0[%c0_6, %c0_7, %c0_8] : memref<2x8x128xf32, #tpu.memory_space<vmem>>, vector<2x8x128xf32>
    %c0_9 = arith.constant 0 : index
    %c0_10 = arith.constant 0 : index
    %4 = vector.load %arg2[%c0_9, %c0_10] : memref<128x128xbf16, #tpu.memory_space<vmem>>, vector<128x128xbf16>
    %c0_11 = arith.constant 0 : index
    %c0_12 = arith.constant 0 : index
    %5 = vector.load %arg3[%c0_11, %c0_12] : memref<1x128xf32, #tpu.memory_space<vmem>>, vector<1x128xf32>
    %6 = vector.shape_cast %3 : vector<2x8x128xf32> to vector<16x128xf32>
    %7 = arith.truncf %6 : vector<16x128xf32> to vector<16x128xbf16>
    %cst = arith.constant dense<0.000000e+00> : vector<16x128xf32>
    %8 = tpu.matmul %7, %4, %cst {dimension_numbers = #tpu.dot_dimension_numbers<[1], [0], [0], [1], [0, 0, 1, 1], [], []>} : vector<16x128xbf16>, vector<128x128xbf16>, vector<16x128xf32> -> vector<16x128xf32>
    %9 = vector.broadcast %5 : vector<1x128xf32> to vector<16x128xf32>
    %10 = arith.addf %8, %9 : vector<16x128xf32>
    %11 = vector.shape_cast %10 : vector<16x128xf32> to vector<2x8x128xf32>
    %12 = vector.extract_strided_slice %0 {offsets = [0, 0, 0], sizes = [2, 8, 1], strides = [1, 1, 1]} : vector<2x8x8xf32> to vector<2x8x1xf32>
    %13 = vector.extract_strided_slice %11 {offsets = [0, 0, 0], sizes = [2, 1, 128], strides = [1, 1, 1]} : vector<2x8x128xf32> to vector<2x1x128xf32>
    %14 = vector.broadcast %12 : vector<2x8x1xf32> to vector<2x8x128xf32>
    %15 = vector.broadcast %13 : vector<2x1x128xf32> to vector<2x8x128xf32>
    %16 = arith.mulf %14, %15 : vector<2x8x128xf32>
    %17 = vector.extract_strided_slice %0 {offsets = [0, 0, 1], sizes = [2, 8, 1], strides = [1, 1, 1]} : vector<2x8x8xf32> to vector<2x8x1xf32>
    %18 = vector.extract_strided_slice %11 {offsets = [0, 1, 0], sizes = [2, 1, 128], strides = [1, 1, 1]} : vector<2x8x128xf32> to vector<2x1x128xf32>
    %19 = vector.broadcast %17 : vector<2x8x1xf32> to vector<2x8x128xf32>
    %20 = vector.broadcast %18 : vector<2x1x128xf32> to vector<2x8x128xf32>
    %21 = arith.mulf %19, %20 : vector<2x8x128xf32>
    %22 = arith.addf %16, %21 : vector<2x8x128xf32>
    %23 = vector.extract_strided_slice %0 {offsets = [0, 0, 2], sizes = [2, 8, 1], strides = [1, 1, 1]} : vector<2x8x8xf32> to vector<2x8x1xf32>
    %24 = vector.extract_strided_slice %11 {offsets = [0, 2, 0], sizes = [2, 1, 128], strides = [1, 1, 1]} : vector<2x8x128xf32> to vector<2x1x128xf32>
    %25 = vector.broadcast %23 : vector<2x8x1xf32> to vector<2x8x128xf32>
    %26 = vector.broadcast %24 : vector<2x1x128xf32> to vector<2x8x128xf32>
    %27 = arith.mulf %25, %26 : vector<2x8x128xf32>
    %28 = arith.addf %22, %27 : vector<2x8x128xf32>
    %29 = vector.extract_strided_slice %0 {offsets = [0, 0, 3], sizes = [2, 8, 1], strides = [1, 1, 1]} : vector<2x8x8xf32> to vector<2x8x1xf32>
    %30 = vector.extract_strided_slice %11 {offsets = [0, 3, 0], sizes = [2, 1, 128], strides = [1, 1, 1]} : vector<2x8x128xf32> to vector<2x1x128xf32>
    %31 = vector.broadcast %29 : vector<2x8x1xf32> to vector<2x8x128xf32>
    %32 = vector.broadcast %30 : vector<2x1x128xf32> to vector<2x8x128xf32>
    %33 = arith.mulf %31, %32 : vector<2x8x128xf32>
    %34 = arith.addf %28, %33 : vector<2x8x128xf32>
    %35 = vector.extract_strided_slice %0 {offsets = [0, 0, 4], sizes = [2, 8, 1], strides = [1, 1, 1]} : vector<2x8x8xf32> to vector<2x8x1xf32>
    %36 = vector.extract_strided_slice %11 {offsets = [0, 4, 0], sizes = [2, 1, 128], strides = [1, 1, 1]} : vector<2x8x128xf32> to vector<2x1x128xf32>
    %37 = vector.broadcast %35 : vector<2x8x1xf32> to vector<2x8x128xf32>
    %38 = vector.broadcast %36 : vector<2x1x128xf32> to vector<2x8x128xf32>
    %39 = arith.mulf %37, %38 : vector<2x8x128xf32>
    %40 = arith.addf %34, %39 : vector<2x8x128xf32>
    %41 = vector.extract_strided_slice %0 {offsets = [0, 0, 5], sizes = [2, 8, 1], strides = [1, 1, 1]} : vector<2x8x8xf32> to vector<2x8x1xf32>
    %42 = vector.extract_strided_slice %11 {offsets = [0, 5, 0], sizes = [2, 1, 128], strides = [1, 1, 1]} : vector<2x8x128xf32> to vector<2x1x128xf32>
    %43 = vector.broadcast %41 : vector<2x8x1xf32> to vector<2x8x128xf32>
    %44 = vector.broadcast %42 : vector<2x1x128xf32> to vector<2x8x128xf32>
    %45 = arith.mulf %43, %44 : vector<2x8x128xf32>
    %46 = arith.addf %40, %45 : vector<2x8x128xf32>
    %47 = vector.extract_strided_slice %0 {offsets = [0, 0, 6], sizes = [2, 8, 1], strides = [1, 1, 1]} : vector<2x8x8xf32> to vector<2x8x1xf32>
    %48 = vector.extract_strided_slice %11 {offsets = [0, 6, 0], sizes = [2, 1, 128], strides = [1, 1, 1]} : vector<2x8x128xf32> to vector<2x1x128xf32>
    %49 = vector.broadcast %47 : vector<2x8x1xf32> to vector<2x8x128xf32>
    %50 = vector.broadcast %48 : vector<2x1x128xf32> to vector<2x8x128xf32>
    %51 = arith.mulf %49, %50 : vector<2x8x128xf32>
    %52 = arith.addf %46, %51 : vector<2x8x128xf32>
    %53 = vector.extract_strided_slice %0 {offsets = [0, 0, 7], sizes = [2, 8, 1], strides = [1, 1, 1]} : vector<2x8x8xf32> to vector<2x8x1xf32>
    %54 = vector.extract_strided_slice %11 {offsets = [0, 7, 0], sizes = [2, 1, 128], strides = [1, 1, 1]} : vector<2x8x128xf32> to vector<2x1x128xf32>
    %55 = vector.broadcast %53 : vector<2x8x1xf32> to vector<2x8x128xf32>
    %56 = vector.broadcast %54 : vector<2x1x128xf32> to vector<2x8x128xf32>
    %57 = arith.mulf %55, %56 : vector<2x8x128xf32>
    %58 = arith.addf %52, %57 : vector<2x8x128xf32>
    %59 = arith.negf %58 : vector<2x8x128xf32>
    %60 = math.exp %59 : vector<2x8x128xf32>
    %cst_13 = arith.constant 1.000000e+00 : f32
    %61 = vector.broadcast %cst_13 : f32 to vector<2x8x128xf32>
    %62 = arith.addf %61, %60 : vector<2x8x128xf32>
    %63 = arith.divf %61, %62 : vector<2x8x128xf32>
    %64 = arith.mulf %58, %63 : vector<2x8x128xf32>
    %cst_14 = arith.constant dense<0.000000e+00> : vector<8xf32>
    %65 = vector.multi_reduction <add>, %64, %cst_14 [0, 2] : vector<2x8x128xf32> to vector<8xf32>
    %66 = vector.shape_cast %65 : vector<8xf32> to vector<1x8x1xf32>
    %67 = arith.mulf %64, %64 : vector<2x8x128xf32>
    %cst_15 = arith.constant dense<0.000000e+00> : vector<8xf32>
    %68 = vector.multi_reduction <add>, %67, %cst_15 [0, 2] : vector<2x8x128xf32> to vector<8xf32>
    %69 = vector.shape_cast %68 : vector<8xf32> to vector<1x8x1xf32>
    %cst_16 = arith.constant 1.562500e-02 : f32
    %70 = vector.broadcast %cst_16 : f32 to vector<1x8x1xf32>
    %71 = arith.mulf %66, %70 : vector<1x8x1xf32>
    %cst_17 = arith.constant 1.562500e-02 : f32
    %72 = vector.broadcast %cst_17 : f32 to vector<1x8x1xf32>
    %73 = arith.mulf %69, %72 : vector<1x8x1xf32>
    %74 = arith.mulf %71, %71 : vector<1x8x1xf32>
    %75 = arith.subf %73, %74 : vector<1x8x1xf32>
    %cst_18 = arith.constant 0.000000e+00 : f32
    %76 = vector.broadcast %cst_18 : f32 to vector<1x8x1xf32>
    %77 = arith.maximumf %75, %76 : vector<1x8x1xf32>
    %cst_19 = arith.constant 9.99999974E-6 : f32
    %78 = vector.broadcast %cst_19 : f32 to vector<1x8x1xf32>
    %79 = arith.addf %77, %78 : vector<1x8x1xf32>
    %80 = math.rsqrt %79 : vector<1x8x1xf32>
    %81 = vector.shape_cast %1 : vector<8x1xf32> to vector<1x8x1xf32>
    %82 = arith.mulf %80, %81 : vector<1x8x1xf32>
    %83 = vector.broadcast %71 : vector<1x8x1xf32> to vector<2x8x128xf32>
    %84 = arith.subf %64, %83 : vector<2x8x128xf32>
    %85 = vector.broadcast %82 : vector<1x8x1xf32> to vector<2x8x128xf32>
    %86 = arith.mulf %84, %85 : vector<2x8x128xf32>
    %87 = vector.shape_cast %2 : vector<8x1xf32> to vector<1x8x1xf32>
    %88 = vector.broadcast %87 : vector<1x8x1xf32> to vector<2x8x128xf32>
    %89 = arith.addf %86, %88 : vector<2x8x128xf32>
    %c0_20 = arith.constant 0 : index
    %c0_21 = arith.constant 0 : index
    %90 = vector.load %arg4[%c0_20, %c0_21] : memref<128x128xbf16, #tpu.memory_space<vmem>>, vector<128x128xbf16>
    %91 = vector.shape_cast %89 : vector<2x8x128xf32> to vector<16x128xf32>
    %92 = arith.truncf %91 : vector<16x128xf32> to vector<16x128xbf16>
    %cst_22 = arith.constant dense<0.000000e+00> : vector<16x128xf32>
    %93 = tpu.matmul %92, %90, %cst_22 {dimension_numbers = #tpu.dot_dimension_numbers<[1], [0], [0], [1], [0, 0, 1, 1], [], []>} : vector<16x128xbf16>, vector<128x128xbf16>, vector<16x128xf32> -> vector<16x128xf32>
    %94 = vector.shape_cast %93 : vector<16x128xf32> to vector<2x8x128xf32>
    %95 = vector.extract_strided_slice %0 {offsets = [0, 0, 0], sizes = [2, 8, 1], strides = [1, 1, 1]} : vector<2x8x8xf32> to vector<2x8x1xf32>
    %96 = vector.extract_strided_slice %94 {offsets = [0, 0, 0], sizes = [2, 1, 128], strides = [1, 1, 1]} : vector<2x8x128xf32> to vector<2x1x128xf32>
    %97 = vector.broadcast %95 : vector<2x8x1xf32> to vector<2x8x128xf32>
    %98 = vector.broadcast %96 : vector<2x1x128xf32> to vector<2x8x128xf32>
    %99 = arith.mulf %97, %98 : vector<2x8x128xf32>
    %100 = vector.extract_strided_slice %0 {offsets = [0, 0, 1], sizes = [2, 8, 1], strides = [1, 1, 1]} : vector<2x8x8xf32> to vector<2x8x1xf32>
    %101 = vector.extract_strided_slice %94 {offsets = [0, 1, 0], sizes = [2, 1, 128], strides = [1, 1, 1]} : vector<2x8x128xf32> to vector<2x1x128xf32>
    %102 = vector.broadcast %100 : vector<2x8x1xf32> to vector<2x8x128xf32>
    %103 = vector.broadcast %101 : vector<2x1x128xf32> to vector<2x8x128xf32>
    %104 = arith.mulf %102, %103 : vector<2x8x128xf32>
    %105 = arith.addf %99, %104 : vector<2x8x128xf32>
    %106 = vector.extract_strided_slice %0 {offsets = [0, 0, 2], sizes = [2, 8, 1], strides = [1, 1, 1]} : vector<2x8x8xf32> to vector<2x8x1xf32>
    %107 = vector.extract_strided_slice %94 {offsets = [0, 2, 0], sizes = [2, 1, 128], strides = [1, 1, 1]} : vector<2x8x128xf32> to vector<2x1x128xf32>
    %108 = vector.broadcast %106 : vector<2x8x1xf32> to vector<2x8x128xf32>
    %109 = vector.broadcast %107 : vector<2x1x128xf32> to vector<2x8x128xf32>
    %110 = arith.mulf %108, %109 : vector<2x8x128xf32>
    %111 = arith.addf %105, %110 : vector<2x8x128xf32>
    %112 = vector.extract_strided_slice %0 {offsets = [0, 0, 3], sizes = [2, 8, 1], strides = [1, 1, 1]} : vector<2x8x8xf32> to vector<2x8x1xf32>
    %113 = vector.extract_strided_slice %94 {offsets = [0, 3, 0], sizes = [2, 1, 128], strides = [1, 1, 1]} : vector<2x8x128xf32> to vector<2x1x128xf32>
    %114 = vector.broadcast %112 : vector<2x8x1xf32> to vector<2x8x128xf32>
    %115 = vector.broadcast %113 : vector<2x1x128xf32> to vector<2x8x128xf32>
    %116 = arith.mulf %114, %115 : vector<2x8x128xf32>
    %117 = arith.addf %111, %116 : vector<2x8x128xf32>
    %118 = vector.extract_strided_slice %0 {offsets = [0, 0, 4], sizes = [2, 8, 1], strides = [1, 1, 1]} : vector<2x8x8xf32> to vector<2x8x1xf32>
    %119 = vector.extract_strided_slice %94 {offsets = [0, 4, 0], sizes = [2, 1, 128], strides = [1, 1, 1]} : vector<2x8x128xf32> to vector<2x1x128xf32>
    %120 = vector.broadcast %118 : vector<2x8x1xf32> to vector<2x8x128xf32>
    %121 = vector.broadcast %119 : vector<2x1x128xf32> to vector<2x8x128xf32>
    %122 = arith.mulf %120, %121 : vector<2x8x128xf32>
    %123 = arith.addf %117, %122 : vector<2x8x128xf32>
    %124 = vector.extract_strided_slice %0 {offsets = [0, 0, 5], sizes = [2, 8, 1], strides = [1, 1, 1]} : vector<2x8x8xf32> to vector<2x8x1xf32>
    %125 = vector.extract_strided_slice %94 {offsets = [0, 5, 0], sizes = [2, 1, 128], strides = [1, 1, 1]} : vector<2x8x128xf32> to vector<2x1x128xf32>
    %126 = vector.broadcast %124 : vector<2x8x1xf32> to vector<2x8x128xf32>
    %127 = vector.broadcast %125 : vector<2x1x128xf32> to vector<2x8x128xf32>
    %128 = arith.mulf %126, %127 : vector<2x8x128xf32>
    %129 = arith.addf %123, %128 : vector<2x8x128xf32>
    %130 = vector.extract_strided_slice %0 {offsets = [0, 0, 6], sizes = [2, 8, 1], strides = [1, 1, 1]} : vector<2x8x8xf32> to vector<2x8x1xf32>
    %131 = vector.extract_strided_slice %94 {offsets = [0, 6, 0], sizes = [2, 1, 128], strides = [1, 1, 1]} : vector<2x8x128xf32> to vector<2x1x128xf32>
    %132 = vector.broadcast %130 : vector<2x8x1xf32> to vector<2x8x128xf32>
    %133 = vector.broadcast %131 : vector<2x1x128xf32> to vector<2x8x128xf32>
    %134 = arith.mulf %132, %133 : vector<2x8x128xf32>
    %135 = arith.addf %129, %134 : vector<2x8x128xf32>
    %136 = vector.extract_strided_slice %0 {offsets = [0, 0, 7], sizes = [2, 8, 1], strides = [1, 1, 1]} : vector<2x8x8xf32> to vector<2x8x1xf32>
    %137 = vector.extract_strided_slice %94 {offsets = [0, 7, 0], sizes = [2, 1, 128], strides = [1, 1, 1]} : vector<2x8x128xf32> to vector<2x1x128xf32>
    %138 = vector.broadcast %136 : vector<2x8x1xf32> to vector<2x8x128xf32>
    %139 = vector.broadcast %137 : vector<2x1x128xf32> to vector<2x8x128xf32>
    %140 = arith.mulf %138, %139 : vector<2x8x128xf32>
    %141 = arith.addf %135, %140 : vector<2x8x128xf32>
    %cst_23 = arith.constant dense<0.000000e+00> : vector<8xf32>
    %142 = vector.multi_reduction <add>, %141, %cst_23 [0, 2] : vector<2x8x128xf32> to vector<8xf32>
    %143 = vector.shape_cast %142 : vector<8xf32> to vector<1x8x1xf32>
    %144 = arith.mulf %141, %141 : vector<2x8x128xf32>
    %cst_24 = arith.constant dense<0.000000e+00> : vector<8xf32>
    %145 = vector.multi_reduction <add>, %144, %cst_24 [0, 2] : vector<2x8x128xf32> to vector<8xf32>
    %146 = vector.shape_cast %145 : vector<8xf32> to vector<1x8x1xf32>
    %cst_25 = arith.constant 3.125000e-02 : f32
    %147 = vector.broadcast %cst_25 : f32 to vector<1x8x1xf32>
    %148 = arith.mulf %143, %147 : vector<1x8x1xf32>
    %cst_26 = arith.constant 3.125000e-02 : f32
    %149 = vector.broadcast %cst_26 : f32 to vector<1x8x1xf32>
    %150 = arith.mulf %146, %149 : vector<1x8x1xf32>
    %151 = arith.mulf %148, %148 : vector<1x8x1xf32>
    %152 = arith.subf %150, %151 : vector<1x8x1xf32>
    %cst_27 = arith.constant 0.000000e+00 : f32
    %153 = vector.broadcast %cst_27 : f32 to vector<1x8x1xf32>
    %154 = arith.maximumf %152, %153 : vector<1x8x1xf32>
    %cst_28 = arith.constant 9.99999974E-6 : f32
    %155 = vector.broadcast %cst_28 : f32 to vector<1x8x1xf32>
    %156 = arith.addf %154, %155 : vector<1x8x1xf32>
    %157 = math.rsqrt %156 : vector<1x8x1xf32>
    %158 = vector.shape_cast %1 : vector<8x1xf32> to vector<1x8x1xf32>
    %159 = arith.mulf %157, %158 : vector<1x8x1xf32>
    %160 = vector.broadcast %148 : vector<1x8x1xf32> to vector<2x8x128xf32>
    %161 = arith.subf %141, %160 : vector<2x8x128xf32>
    %162 = vector.broadcast %159 : vector<1x8x1xf32> to vector<2x8x128xf32>
    %163 = arith.mulf %161, %162 : vector<2x8x128xf32>
    %164 = vector.shape_cast %2 : vector<8x1xf32> to vector<1x8x1xf32>
    %165 = vector.broadcast %164 : vector<1x8x1xf32> to vector<2x8x128xf32>
    %166 = arith.addf %163, %165 : vector<2x8x128xf32>
    %cst_29 = arith.constant 0.000000e+00 : f32
    %167 = vector.broadcast %cst_29 : f32 to vector<2x8x128xf32>
    %168 = arith.cmpf oge, %166, %167 : vector<2x8x128xf32>
    %cst_30 = arith.constant 0.229166672 : f32
    %169 = vector.broadcast %cst_30 : f32 to vector<2x8x128xf32>
    %170 = arith.mulf %169, %166 : vector<2x8x128xf32>
    %171 = arith.select %168, %166, %170 : vector<2x8x128xi1>, vector<2x8x128xf32>
    %c0_31 = arith.constant 0 : index
    %c0_32 = arith.constant 0 : index
    %c0_33 = arith.constant 0 : index
    %172 = vector.load %arg7[%c0_31, %c0_32, %c0_33] : memref<2x8x128xf32, #tpu.memory_space<vmem>>, vector<2x8x128xf32>
    tpu.vector_store %arg7[%c0_31, %c0_32, %c0_33], %171 {strides = array<i32>} : memref<2x8x128xf32, #tpu.memory_space<vmem>>, vector<2x8x128xf32>,
    return
  }
}

</mosaic_0001>

<bundles_post_ra>
// kernel: gcn_forward.1
= control target key start
LH: loop header
LB: loop body
LE: loop exit
PB: predicated region body
PF: predicated region fallthrough
CT: control target
= control target key end

     0   :  { %v644_v2 = vmov 1   ;;  %v645_v3 = vmov 0   ;;  %v646_v5 = vmov 2   ;;  %s841_s0 = inlined_call_operand.vmem [shape: f32[2,8,128], index: 0, kind: input, shape index: {}]   ;;  %s842_s1 = inlined_call_operand.vmem [shape: f32[2,8,8], index: 1, kind: input, shape index: {}]   ;;  %s843_s2 = inlined_call_operand.vmem [shape: bf16[128,128], index: 2, kind: input, shape index: {}]   ;;  %s844_s3 = inlined_call_operand.vmem [shape: f32[1,128], index: 3, kind: input, shape index: {}]   ;;  %s845_s4 = inlined_call_operand.vmem [shape: bf16[128,128], index: 4, kind: input, shape index: {}]   ;;  %s846_s5 = inlined_call_operand.vmem [shape: f32[8,1], index: 5, kind: input, shape index: {}]   ;;  %s847_s6 = inlined_call_operand.vmem [shape: f32[8,1], index: 6, kind: input, shape index: {}]   ;;  %s848_s7 = inlined_call_operand.hbm [shape: f32[2,8,128], index: 7, kind: output, shape index: {}]  }
   0x1   :  { %v569_v0 = vld [vmem:[%s843_s2 + $0x38] sm:$0xff]  ;;  %v27_v1 = vld [vmem:[%s842_s1] sm:$0xff]  ;;  %590 = vset.pattern.permute.xlu1 %v644_v2  ;;  %589 = vset.pattern.permute.xlu0 %v645_v3  ;;  %v568_v4 = vld [vmem:[%s843_s2 + $0x30] sm:$0xff] }
   0x2   :  { %102 = vmatpush.bf16.msra.mxu0 %v569_v0  ;;  %131 = vperm.xlu1 %590, %v27_v1  }
   0x3   :  { %118 = vperm.xlu0 %589, %v27_v1   ;;  %591 = vset.pattern.permute.xlu2 %v646_v5 }
   0x4   :  { %145 = vperm.xlu2 %591, %v27_v1  }
   0x5   :  { %12 = vsyncpa [#allocation3], 0  ;;  %v567_v6 = vld [vmem:[%s843_s2 + $0x28] sm:$0xff]  ;;  %v566_v8 = vld [vmem:[%s843_s2 + $0x20] sm:$0xff]  ;;  %v647_v10 = vmov 3   ;;  %v648_v12 = vmov 4  }
   0x6   :  { %103 = vmatpush.bf16.msra.mxu0 %v568_v4  ;;  %v28_v7 = vld [vmem:[%s842_s1 + $0x8] sm:$0xff]  ;;  %v565_v9 = vld [vmem:[%s843_s2 + $0x18] sm:$0xff]  ;;  %v564_v11 = vld [vmem:[%s843_s2 + $0x10] sm:$0xff]  ;;  %v649_v17 = vmov 5   ;;  %v650_v19 = vmov 6   ;;  %v651_v20 = vmov 7  }
   0x7   :  { %v563_v13 = vld [vmem:[%s843_s2 + $0x8] sm:$0xff]  ;;  %v562_v14 = vld [vmem:[%s843_s2] sm:$0xff]  ;;  %s484_s20 = sshll.u32 %s848_s7, 4  ;;  %s653_s21 = smov 128   ;;  %s485_s20 = int_to_ptr.hbm [resolvable:$true] %s484_s20 }
   0x8   :  { %v31_v15 = vld [vmem:[%s841_s0] sm:$0xff]  ;;  %v32_v16 = vld [vmem:[%s841_s0 + $0x8] sm:$0xff]  ;;  %s654_s22 = smov 8  }
   0x9   :  { %v50_v18 = vpack.c.bf16 %v32_v16, %v31_v15  ;;  %v605_v29 = vld [vmem:[%s844_s3] ss:$0 sm:$0xff] }
   0xa   :  { %104 = vmatpush.bf16.msra.mxu0 %v567_v6  ;;  %135 = vperm.xlu1 %590, %v28_v7  }
   0xb   :  { %123 = vperm.xlu0 %589, %v28_v7  }
   0xc   :  { %149 = vperm.xlu2 %591, %v28_v7  }
   0xe   :  { %105 = vmatpush.bf16.msra.mxu0 %v566_v8 }
  0x12   :  { %106 = vmatpush.bf16.msra.mxu0 %v565_v9  ;;  %593 = vset.pattern.permute.xlu1 %v647_v10 }
  0x13   :  { %163 = vperm.xlu1 %593, %v28_v7   ;;  %592 = vset.pattern.permute.xlu0 %v647_v10 }
  0x14   :  { %159 = vperm.xlu0 %592, %v27_v1   ;;  %594 = vset.pattern.permute.xlu2 %v648_v12 }
  0x15   :  { %173 = vperm.xlu2 %594, %v27_v1  }
  0x16   :  { %107 = vmatpush.bf16.msra.mxu0 %v564_v11 }
  0x1a   :  { %108 = vmatpush.bf16.msra.mxu0 %v563_v13 }
  0x1b   :  { %595 = vset.pattern.permute.xlu1 %v648_v12 }
  0x1c   :  { %177 = vperm.xlu1 %595, %v28_v7   ;;  %597 = vset.pattern.permute.xlu0 %v649_v17 }
  0x1d   :  { %191 = vperm.xlu0 %597, %v28_v7   ;;  %596 = vset.pattern.permute.xlu2 %v649_v17 }
  0x1e   :  { %109 = vmatpush.bf16.msra.mxu0 %v562_v14  ;;  %187 = vperm.xlu2 %596, %v27_v1  }
  0x21   :  { %110 = vmatmul.bf16.vlgmr.msra.gmra.mxu0 %v50_v18 }
  0x24   :  { %598 = vset.pattern.permute.xlu1 %v650_v19 }
  0x25   :  { %201 = vperm.xlu1 %598, %v27_v1   ;;  %604 = vset.pattern.permute.xlu0 %v645_v3 }
  0x26   :  { %599 = vset.pattern.permute.xlu2 %v650_v19 }
  0x27   :  { %205 = vperm.xlu2 %599, %v28_v7  }
  0x2d   :  { %600 = vset.pattern.permute.xlu1 %v651_v20 }
  0x2e   :  { %215 = vperm.xlu1 %600, %v27_v1  }
  0x2f   :  { %601 = vset.pattern.permute.xlu2 %v651_v20 }
  0x30   :  { %219 = vperm.xlu2 %601, %v28_v7  }
  0x36   :  { %603 = vset.pattern.permute.xlu1 %v645_v3 }
  0x38   :  { %602 = vset.pattern.permute.xlu2 %v645_v3 }
  0x5e   :  { %v733_v22 = vpop.permute.xlu2 %145 }
  0x66   :  { %v737_v24 = vpop.permute.xlu2 %149 }
  0x6f   :  { %v743_v27 = vpop.permute.xlu2 %173 }
  0x74   :  { %v731_v21 = vpop.permute.xlu1 %131 }
  0x75   :  { %v741_v26 = vpop.permute.xlu0 %118 }
  0x78   :  { %v752_v33 = vpop.permute.xlu2 %187 }
  0x7c   :  { %v735_v23 = vpop.permute.xlu1 %135 }
  0x7d   :  { %v750_v30 = vpop.permute.xlu0 %123 }
  0x81   :  { %v763_v55 = vpop.permute.xlu2 %205 }
  0x85   :  { %v739_v25 = vpop.permute.xlu1 %163 }
  0x86   :  { %v758_v41 = vpop.permute.xlu0 %159 }
  0x8a   :  { %v778_v19 = vpop.permute.xlu2 %219 }
  0x8e   :  { %v745_v28 = vpop.permute.xlu1 %177 }
  0x8f   :  { %v774_v10 = vpop.permute.xlu0 %191 }
  0x97   :  { %v754_v34 = vpop.permute.xlu1 %201 }
  0x9e   :  { %v111_v31 = vpop.f32.mrf.mxu0 }
  0x9f   :  { %v112_v32 = vadd.f32 %v605_v29, %v111_v31 }
  0xa0   :  { %v766_v59 = vpop.permute.xlu1 %215 }
  0xa1   :  { %v126_v35 = vperm.slane %v112_v32, 0  ;;  %v138_v36 = vperm.slane %v112_v32, 1  ;;  %v152_v37 = vperm.slane %v112_v32, 2  ;;  %v166_v40 = vperm.slane %v112_v32, 3 }
  0xa2   :  { %v180_v44 = vperm.slane %v112_v32, 4  ;;  %v194_v45 = vperm.slane %v112_v32, 5  ;;  %v208_v50 = vperm.slane %v112_v32, 6  ;;  %v222_v56 = vperm.slane %v112_v32, 7 }
  0xa3   :  { %v128_v38 = vmul.f32 %v126_v35, %v741_v26  ;;  %v140_v39 = vmul.f32 %v138_v36, %v731_v21  ;;  %v154_v43 = vmul.f32 %v152_v37, %v733_v22  ;;  %v168_v48 = vmul.f32 %v166_v40, %v758_v41 }
  0xa4   :  { %v182_v51 = vmul.f32 %v180_v44, %v743_v27  ;;  %v196_v57 = vmul.f32 %v194_v45, %v752_v33  ;;  %v210_v0 = vmul.f32 %v208_v50, %v754_v34  ;;  %v224_v5 = vmul.f32 %v222_v56, %v766_v59 }
  0xa5   :  { %v142_v42 = vadd.f32 %v140_v39, %v128_v38 }
  0xa6   :  { %v113_v46 = vpop.f32.mrf.mxu0 }
  0xa7   :  { %v156_v47 = vadd.f32 %v154_v43, %v142_v42  ;;  %v114_v49 = vadd.f32 %v605_v29, %v113_v46 }
  0xa9   :  { %v170_v52 = vadd.f32 %v168_v48, %v156_v47  ;;  %v127_v53 = vperm.slane %v114_v49, 0  ;;  %v139_v54 = vperm.slane %v114_v49, 1  ;;  %v153_v58 = vperm.slane %v114_v49, 2 }
  0xaa   :  { %v167_v63 = vperm.slane %v114_v49, 3  ;;  %v181_v4 = vperm.slane %v114_v49, 4  ;;  %v195_v9 = vperm.slane %v114_v49, 5  ;;  %v209_v13 = vperm.slane %v114_v49, 6 }
  0xab   :  { %v184_v60 = vadd.f32 %v182_v51, %v170_v52  ;;  %v129_v61 = vmul.f32 %v127_v53, %v750_v30  ;;  %v141_v62 = vmul.f32 %v139_v54, %v735_v23  ;;  %v155_v3 = vmul.f32 %v153_v58, %v737_v24 }
  0xac   :  { %v169_v8 = vmul.f32 %v167_v63, %v739_v25  ;;  %v183_v12 = vmul.f32 %v181_v4, %v745_v28  ;;  %v223_v15 = vperm.slane %v114_v49, 7  ;;  %v197_v17 = vmul.f32 %v195_v9, %v774_v10 }
  0xad   :  { %v198_v1 = vadd.f32 %v196_v57, %v184_v60  ;;  %v143_v2 = vadd.f32 %v141_v62, %v129_v61  ;;  %v211_v20 = vmul.f32 %v209_v13, %v763_v55 }
  0xae   :  { %v225_v31 = vmul.f32 %v223_v15, %v778_v19  ;;  %v577_v15 = vld [vmem:[%s845_s4 + $0x38] sm:$0xff] }
  0xaf   :  { %v212_v6 = vadd.f32 %v210_v0, %v198_v1  ;;  %v157_v7 = vadd.f32 %v155_v3, %v143_v2  ;;  %374 = vmatpush.bf16.msra.mxu1 %v577_v15 }
  0xb1   :  { %v171_v11 = vadd.f32 %v169_v8, %v157_v7  ;;  %v226_v14 = vadd.f32 %v224_v5, %v212_v6 }
  0xb3   :  { %v185_v16 = vadd.f32 %v183_v12, %v171_v11  ;;  %v528_v18 = vmul.f32 -1.442695, %v226_v14 }
  0xb5   :  { %v199_v29 = vadd.f32 %v197_v17, %v185_v16  ;;  %606 = vpow2.f32 %v528_v18  ;;  %v576_v16 = vld [vmem:[%s845_s4 + $0x30] sm:$0xff]  ;;  %v575_v17 = vld [vmem:[%s845_s4 + $0x28] sm:$0xff] }
  0xb6   :  { %375 = vmatpush.bf16.msra.mxu1 %v576_v16 }
  0xb7   :  { %v213_v32 = vadd.f32 %v211_v20, %v199_v29  ;;  %v574_v20 = vld [vmem:[%s845_s4 + $0x20] sm:$0xff] }
  0xb9   :  { %v227_v35 = vadd.f32 %v225_v31, %v213_v32  ;;  %v573_v32 = vld [vmem:[%s845_s4 + $0x18] sm:$0xff] }
  0xba   :  { %376 = vmatpush.bf16.msra.mxu1 %v575_v17 }
  0xbb   :  { %v607_v36 = vpop.eup %606  ;;  %v529_v37 = vmul.f32 -1.442695, %v227_v35 }
  0xbc   :  { %v234_v38 = vadd.f32 1.0, %v607_v36 }
  0xbd   :  { %608 = vpow2.f32 %v529_v37  ;;  %v800_v37 = vld [vmem:[%s846_s5] sm:$0xff] }
  0xbe   :  { %610 = vrcp.f32 %v234_v38  ;;  %v247_v48 = vand.u32 2147483648, %v234_v38  ;;  %vm241_vm1 = vweird.f32 %v234_v38  ;;  %v245_v49 = vand.u32 2147483647, %v234_v38  ;;  %377 = vmatpush.bf16.msra.mxu1 %v574_v20 }
  0xc0   :  { %v248_v53 = vor.u32 1.1754944e-38, %v247_v48  ;;  %vm246_vm3 = vcmp.eq.f32.partialorder %v245_v49, 8.507059e+37 }
  0xc2   :  { %378 = vmatpush.bf16.msra.mxu1 %v573_v32 }
  0xc3   :  { %v609_v39 = vpop.eup %608 }
  0xc4   :  { %v611_v40 = vpop.eup %610  ;;  %v235_v42 = vadd.f32 1.0, %v609_v39 }
  0xc5   :  { %v237_v43 = vmul.f32 %v611_v40, %v234_v38  ;;  %vm242_vm0 = vweird.f32 %v611_v40 }
  0xc6   :  { %612 = vrcp.f32 %v235_v42  ;;  %vm243_vm2 = vmor %vm241_vm1, %vm242_vm0  ;;  %v262_v54 = vand.u32 2147483648, %v235_v42  ;;  %v260_v57 = vand.u32 2147483647, %v235_v42  ;;  %vm256_vm5 = vweird.f32 %v235_v42 }
  0xc7   :  { %v238_v44 = vsub.f32 1.0, %v237_v43  ;;  %v572_v43 = vld [vmem:[%s845_s4 + $0x10] sm:$0xff] }
  0xc8   :  { %v263_v61 = vor.u32 1.1754944e-38, %v262_v54  ;;  %vm261_vm7 = vcmp.eq.f32.partialorder %v260_v57, 8.507059e+37  ;;  %379 = vmatpush.bf16.msra.mxu1 %v572_v43 }
  0xc9   :  { %v239_v45 = vmul.f32 %v611_v40, %v238_v44  ;;  %v571_v44 = vld [vmem:[%s845_s4 + $0x8] sm:$0xff] }
  0xcb   :  { %v240_v46 = vadd.f32 %v611_v40, %v239_v45  ;;  %v570_v45 = vld [vmem:[%s845_s4] sm:$0xff]  ;;  %s652_s4 = smov [#allocation2]  }
  0xcc   :  { %v613_v47 = vpop.eup %612  ;;  %380 = vmatpush.bf16.msra.mxu1 %v571_v44 }
  0xcd   :  { %v252_v50 = vmul.f32 %v613_v47, %v235_v42  ;;  %v244_v51 = vsel %vm243_vm2, %v611_v40, %v240_v46  ;;  %vm257_vm4 = vweird.f32 %v613_v47  ;;  %v30_v42 = vld [vmem:[%s847_s6] sm:$0xff]  ;;  %s482_s6 = sshll.u32 %s652_s4, 4  ;;  %s483_s6 = int_to_ptr.vmem [resolvable:$true] %s482_s6 }
  0xce   :  { %v249_v58 = vsel %vm246_vm3, %v248_v53, %v244_v51  ;;  %vm258_vm6 = vmor %vm256_vm5, %vm257_vm4 }
  0xcf   :  { %v253_v52 = vsub.f32 1.0, %v252_v50  ;;  %v266_v63 = vmul.f32 %v249_v58, %v226_v14 }
  0xd0   :  { %381 = vmatpush.bf16.msra.mxu1 %v570_v45 }
  0xd1   :  { %v254_v56 = vmul.f32 %v613_v47, %v253_v52  ;;  %v271_v3 = vmul.f32 %v266_v63, %v266_v63 }
  0xd3   :  { %v255_v60 = vadd.f32 %v613_v47, %v254_v56 }
  0xd5   :  { %v259_v62 = vsel %vm258_vm6, %v613_v47, %v255_v60 }
  0xd6   :  { %v264_v0 = vsel %vm261_vm7, %v263_v61, %v259_v62 }
  0xd7   :  { %v267_v1 = vmul.f32 %v264_v0, %v227_v35 }
  0xd9   :  { %v268_v2 = vadd.f32 %v267_v1, %v266_v63  ;;  %v272_v4 = vmul.f32 %v267_v1, %v267_v1 }
  0xdb   :  { %269 = vadd.xlane.f32.xlu0 %v268_v2  ;;  %v273_v5 = vadd.f32 %v272_v4, %v271_v3 }
  0xdd   :  { %274 = vadd.xlane.f32.xlu1 %v273_v5 }
 0x14e   :  { %v270_v6 = vpop.xlane.xlu0 %269 }
 0x14f   :  { %v276_v7 = vmul.f32 0.015625, %v270_v6 }
 0x150   :  { %v275_v8 = vpop.xlane.xlu1 %274 }
 0x151   :  { %v277_v9 = vmul.f32 0.015625, %v275_v8  ;;  %v278_v11 = vmul.f32 %v276_v7, %v276_v7  ;;  %v293_v47 = vsub.f32 %v266_v63, %v276_v7  ;;  %v294_v48 = vsub.f32 %v267_v1, %v276_v7 }
 0x153   :  { %v279_v12 = vsub.f32 %v277_v9, %v278_v11 }
 0x155   :  { %v280_v13 = vmax.f32 %v279_v12, 0.0 }
 0x157   :  { %v281_v14 = vadd.f32 1e-05, %v280_v13 }
 0x159   :  { %614 = vrsqrt.f32 %v281_v14  ;;  %vm288_vm9 = vweird.f32 %v281_v14 }
 0x15f   :  { %v615_v18 = vpop.eup %614 }
 0x160   :  { %v283_v29 = vmul.f32 %v615_v18, %v281_v14  ;;  %vm289_vm8 = vweird.f32 %v615_v18 }
 0x161   :  { %vm290_vm10 = vmor %vm288_vm9, %vm289_vm8 }
 0x162   :  { %v284_v31 = vmul.f32 %v615_v18, %v283_v29 }
 0x164   :  { %v285_v35 = vmul.f32 0.5, %v284_v31 }
 0x166   :  { %v286_v36 = vsub.f32 1.5, %v285_v35 }
 0x168   :  { %v287_v38 = vmul.f32 %v615_v18, %v286_v36 }
 0x16a   :  { %v291_v39 = vsel %vm290_vm10, %v615_v18, %v287_v38 }
 0x16b   :  { %v292_v40 = vmul.f32 %v291_v39, %v800_v37 }
 0x16d   :  { %297 = vperm.xlu2 %602, %v292_v40  }
 0x175   :  { %304 = vperm.xlu2 %602, %v30_v42  }
 0x1c7   :  { %v298_v46 = vpop.permute.xlu2 %297 }
 0x1c8   :  { %v300_v49 = vmul.f32 %v298_v46, %v293_v47  ;;  %v301_v50 = vmul.f32 %v298_v46, %v294_v48 }
 0x1cf   :  { %v815_v51 = vpop.permute.xlu2 %304 }
 0x1d0   :  { %v307_v52 = vadd.f32 %v815_v51, %v300_v49  ;;  %v308_v53 = vadd.f32 %v815_v51, %v301_v50 }
 0x1d2   :  { %v325_v54 = vpack.c.bf16 %v308_v53, %v307_v52 }
 0x1d4   :  { %382 = vmatmul.bf16.vlgmr.msra.gmra.mxu1 %v325_v54 }
 0x251   :  { %v383_v56 = vpop.f32.mrf.mxu1 }
 0x252   :  { %v388_v57 = vperm.slane %v383_v56, 0  ;;  %v392_v58 = vperm.slane %v383_v56, 1  ;;  %v398_v60 = vperm.slane %v383_v56, 2  ;;  %v404_v63 = vperm.slane %v383_v56, 3 }
 0x253   :  { %v410_v2 = vperm.slane %v383_v56, 4  ;;  %v416_v9 = vperm.slane %v383_v56, 5  ;;  %v422_v14 = vperm.slane %v383_v56, 6  ;;  %v428_v32 = vperm.slane %v383_v56, 7 }
 0x254   :  { %v390_v61 = vmul.f32 %v388_v57, %v741_v26  ;;  %v394_v62 = vmul.f32 %v392_v58, %v731_v21  ;;  %v400_v1 = vmul.f32 %v398_v60, %v733_v22  ;;  %v406_v5 = vmul.f32 %v404_v63, %v758_v41 }
 0x255   :  { %v412_v12 = vmul.f32 %v410_v2, %v743_v27  ;;  %v418_v41 = vmul.f32 %v416_v9, %v752_v33  ;;  %v430_v42 = vmul.f32 %v428_v32, %v766_v59 }
 0x256   :  { %v396_v0 = vadd.f32 %v394_v62, %v390_v61 }
 0x258   :  { %v402_v3 = vadd.f32 %v400_v1, %v396_v0 }
 0x259   :  { %v385_v4 = vpop.f32.mrf.mxu1 }
 0x25a   :  { %v389_v6 = vperm.slane %v385_v4, 0  ;;  %v393_v7 = vperm.slane %v385_v4, 1  ;;  %v399_v8 = vperm.slane %v385_v4, 2  ;;  %v408_v11 = vadd.f32 %v406_v5, %v402_v3 }
 0x25b   :  { %v405_v13 = vperm.slane %v385_v4, 3  ;;  %v411_v16 = vperm.slane %v385_v4, 4  ;;  %v417_v29 = vperm.slane %v385_v4, 5  ;;  %v423_v35 = vperm.slane %v385_v4, 6 }
 0x25c   :  { %v391_v26 = vmul.f32 %v389_v6, %v750_v30  ;;  %v395_v21 = vmul.f32 %v393_v7, %v735_v23  ;;  %v414_v15 = vadd.f32 %v412_v12, %v408_v11  ;;  %v401_v22 = vmul.f32 %v399_v8, %v737_v24 }
 0x25d   :  { %v407_v20 = vmul.f32 %v405_v13, %v739_v25  ;;  %v413_v30 = vmul.f32 %v411_v16, %v745_v28  ;;  %v424_v23 = vmul.f32 %v422_v14, %v754_v34  ;;  %v419_v38 = vmul.f32 %v417_v29, %v774_v10 }
 0x25e   :  { %v397_v17 = vadd.f32 %v395_v21, %v391_v26  ;;  %v420_v31 = vadd.f32 %v418_v41, %v414_v15  ;;  %v429_v39 = vperm.slane %v385_v4, 7  ;;  %v425_v33 = vmul.f32 %v423_v35, %v763_v55 }
 0x260   :  { %v403_v18 = vadd.f32 %v401_v22, %v397_v17  ;;  %v426_v24 = vadd.f32 %v424_v23, %v420_v31  ;;  %v431_v43 = vmul.f32 %v429_v39, %v778_v19 }
 0x262   :  { %v409_v27 = vadd.f32 %v407_v20, %v403_v18  ;;  %v432_v44 = vadd.f32 %v430_v42, %v426_v24 }
 0x264   :  { %v415_v36 = vadd.f32 %v413_v30, %v409_v27  ;;  %v437_v28 = vmul.f32 %v432_v44, %v432_v44 }
 0x266   :  { %v421_v40 = vadd.f32 %v419_v38, %v415_v36 }
 0x268   :  { %v427_v25 = vadd.f32 %v425_v33, %v421_v40 }
 0x26a   :  { %v433_v45 = vadd.f32 %v431_v43, %v427_v25 }
 0x26c   :  { %v434_v46 = vadd.f32 %v433_v45, %v432_v44  ;;  %v438_v47 = vmul.f32 %v433_v45, %v433_v45 }
 0x26e   :  { %435 = vadd.xlane.f32.xlu2 %v434_v46  ;;  %v439_v34 = vadd.f32 %v438_v47, %v437_v28 }
 0x270   :  { %440 = vadd.xlane.f32.xlu0 %v439_v34 }
 0x2e1   :  { %v436_v48 = vpop.xlane.xlu2 %435 }
 0x2e2   :  { %v442_v10 = vmul.f32 0.03125, %v436_v48 }
 0x2e3   :  { %v441_v49 = vpop.xlane.xlu0 %440 }
 0x2e4   :  { %v443_v50 = vmul.f32 0.03125, %v441_v49  ;;  %v444_v52 = vmul.f32 %v442_v10, %v442_v10  ;;  %v459_v63 = vsub.f32 %v432_v44, %v442_v10  ;;  %v460_v0 = vsub.f32 %v433_v45, %v442_v10 }
 0x2e6   :  { %v445_v53 = vsub.f32 %v443_v50, %v444_v52 }
 0x2e8   :  { %v446_v55 = vmax.f32 %v445_v53, 0.0 }
 0x2ea   :  { %v447_v54 = vadd.f32 1e-05, %v446_v55 }
 0x2ec   :  { %616 = vrsqrt.f32 %v447_v54  ;;  %vm454_vm12 = vweird.f32 %v447_v54 }
 0x2f2   :  { %v617_v59 = vpop.eup %616 }
 0x2f3   :  { %v449_v56 = vmul.f32 %v617_v59, %v447_v54  ;;  %vm455_vm11 = vweird.f32 %v617_v59 }
 0x2f4   :  { %vm456_vm13 = vmor %vm454_vm12, %vm455_vm11 }
 0x2f5   :  { %v450_v19 = vmul.f32 %v617_v59, %v449_v56 }
 0x2f7   :  { %v451_v57 = vmul.f32 0.5, %v450_v19 }
 0x2f9   :  { %v452_v58 = vsub.f32 1.5, %v451_v57 }
 0x2fb   :  { %v453_v60 = vmul.f32 %v617_v59, %v452_v58 }
 0x2fd   :  { %v457_v61 = vsel %vm456_vm13, %v617_v59, %v453_v60 }
 0x2fe   :  { %v458_v62 = vmul.f32 %v457_v61, %v800_v37 }
 0x300   :  { %463 = vperm.xlu1 %603, %v458_v62  }
 0x372   :  { %v464_v1 = vpop.permute.xlu1 %463 }
 0x373   :  { %v466_v2 = vmul.f32 %v464_v1, %v459_v63  ;;  %v467_v3 = vmul.f32 %v464_v1, %v460_v0 }
 0x375   :  { %v468_v4 = vadd.f32 %v466_v2, %v815_v51  ;;  %v469_v5 = vadd.f32 %v467_v3, %v815_v51 }
 0x377   :  { %vm470_vm14 = vcmp.ge.f32.partialorder %v468_v4, 0.0  ;;  %vm471_vm15 = vcmp.ge.f32.partialorder %v469_v5, 0.0  ;;  %v472_v6 = vmul.f32 0.22916667, %v468_v4  ;;  %v473_v37 = vmul.f32 0.22916667, %v469_v5 }
 0x379   :  { %v474_v7 = vsel %vm470_vm14, %v468_v4, %v472_v6  ;;  %v475_v8 = vsel %vm471_vm15, %v469_v5, %v473_v37 }
 0x37a   :  { %476 = vst [vmem:[#allocation2] sm:$0xff] %v474_v7 }
 0x37b   :  { %477 = vst [vmem:[#allocation2 + $0x8] sm:$0xff] %v475_v8 }
 0x37c   :  { %490 = dma.vmem_to_hbm [thread:$0]  %s483_s6, 256, %s485_s20, [#allocation3], %s653_s21, %s653_s21, %s654_s22  }
 0x37d   :  { %642 = dma.done.wait [#allocation3], 256  }
 0x37e   :  { %643 = vsyncadd [#allocation3], 4294967040 }
 0x37f   :  { %495 = vsyncpa [#allocation3], 1 }

</bundles_post_ra>
